<compile_context>
chip_gen: v6e
topology: v6e:2x2x1
jax: 0.10.0
libtpu: 0.0.40
codegen_flags: <defaults>
</compile_context>

<pallas_src>
import jax
import jax.numpy as jnp
from jax.experimental import pallas as pl
from jax.experimental.pallas import tpu as pltpu


def _round_up(x, m):
    return (x + m - 1) // m * m


# ----------------------------------------------------------------------------
# Kernel
# ----------------------------------------------------------------------------
def fefinal_kernel(x_ref, w1_ref, a1_ref, w2_ref, a2_ref, w3_ref, b3_ref,
                   o_ref, acc_ref):
    k = pl.program_id(1)

    @pl.when(k == 0)
    def _init():
        acc_ref[...] = jnp.zeros_like(acc_ref)

    # Layer 1, K-streamed: acc += x_tile @ W1_tile  (bf16 x bf16 -> f32 MXU).
    acc_ref[...] += jnp.dot(x_ref[...], w1_ref[...],
                            preferred_element_type=jnp.float32)

    @pl.when(k == pl.num_programs(1) - 1)
    def _epilogue():
        # Folded Linear-bias + BatchNorm affine, then ReLU (f32 on the VPU).
        h1 = acc_ref[...] * a1_ref[0, :] + a1_ref[1, :]
        h1 = jnp.maximum(h1, 0.0)
        # Dropout(0.4): identity in eval mode.

        # Layer 2: W2 resident in VMEM, bf16 operands, f32 accumulate.
        h2 = jnp.dot(h1.astype(w2_ref.dtype), w2_ref[...],
                     preferred_element_type=jnp.float32)
        h2 = h2 * a2_ref[0, :] + a2_ref[1, :]
        h2 = jnp.maximum(h2, 0.0)

        # Layer 3: output width is 1 -> VPU/XLU reduction, not an N=1 matmul.
        w3 = w3_ref[0, :].astype(jnp.float32)
        y = jnp.sum(h2 * w3, axis=-1, keepdims=True)
        o_ref[...] = y + b3_ref[0, 0]


# ----------------------------------------------------------------------------
# Wrapper
# ----------------------------------------------------------------------------
def dl_model_head(features_nchw, params, *, tile_b=256, tile_k=512,
                  vmem_limit_bytes=32 * 1024 * 1024):
    """features_nchw: [B, C, Hf, Wf] float32 -> [B, 1] float32."""
    w1, a1, w2, a2, w3, b3 = params
    d_in, h1 = w1.shape
    h2 = w2.shape[1]

    B = features_nchw.shape[0]
    x = features_nchw.reshape(B, -1).astype(jnp.bfloat16)   # torch .view(B, -1)
    assert x.shape[1] == d_in

    # Batch tiling: whole (8-padded) batch in one block when it is small,
    # otherwise tiles of `tile_b` rows (multiple of 8).
    tb = min(tile_b, _round_up(B, 8))
    bp = _round_up(B, tb)

    # K tiling: stream W1 in (tk, h1) slabs (tk multiple of 128).
    tk = min(_round_up(tile_k, 128), _round_up(d_in, 128))
    kp = _round_up(d_in, tk)

    if (bp, kp) != (B, d_in):
        x = jnp.pad(x, ((0, bp - B), (0, kp - d_in)))
    w1p = w1 if kp == d_in else jnp.pad(w1, ((0, kp - d_in), (0, 0)))

    grid = (bp // tb, kp // tk)

    out = pl.pallas_call(
        fefinal_kernel,
        out_shape=jax.ShapeDtypeStruct((bp, 1), jnp.float32),
        grid=grid,
        in_specs=[
            pl.BlockSpec((tb, tk), lambda b, k: (b, k)),     # x tile
            pl.BlockSpec((tk, h1), lambda b, k: (k, 0)),     # W1 slab (streamed)
            pl.BlockSpec((2, h1), lambda b, k: (0, 0)),      # layer-1 scale/shift
            pl.BlockSpec((h1, h2), lambda b, k: (0, 0)),     # W2 (resident)
            pl.BlockSpec((2, h2), lambda b, k: (0, 0)),      # layer-2 scale/shift
            pl.BlockSpec((1, h2), lambda b, k: (0, 0)),      # W3 row (resident)
            pl.BlockSpec(memory_space=pltpu.MemorySpace.SMEM),  # b3 scalar
        ],
        out_specs=pl.BlockSpec((tb, 1), lambda b, k: (b, 0)),
        scratch_shapes=[pltpu.VMEM((tb, h1), jnp.float32)],  # layer-1 accumulator
        compiler_params=pltpu.CompilerParams(
            dimension_semantics=("parallel", "arbitrary"),
            vmem_limit_bytes=vmem_limit_bytes),
    )(x, w1p, a1, w2, a2, w3, b3)

    return out[:B]


# ----------------------------------------------------------------------------
# Parameters / reference
# ----------------------------------------------------------------------------
def fold_linear_bn(bias, gamma, beta, run_mean, run_var, eps=1e-5):
    """Fold Linear bias + BatchNorm1d(running stats) into per-feature scale/shift."""
    scale = gamma / jnp.sqrt(run_var + eps)
    shift = (bias - run_mean) * scale + beta
    return jnp.stack([scale, shift], axis=0).astype(jnp.float32)   # [2, H]


def make_params(key, d_in, h1, h2):
    ks = jax.random.split(key, 14)
    sc = 0.02
    w1 = (sc * jax.random.normal(ks[0], (d_in, h1), jnp.float32)).astype(jnp.bfloat16)
    b1 = sc * jax.random.normal(ks[1], (h1,), jnp.float32)
    g1 = 1.0 + sc * jax.random.normal(ks[2], (h1,), jnp.float32)
    be1 = sc * jax.random.normal(ks[3], (h1,), jnp.float32)
    m1 = sc * jax.random.normal(ks[4], (h1,), jnp.float32)
    v1 = jnp.abs(1.0 + sc * jax.random.normal(ks[5], (h1,), jnp.float32))

    w2 = (sc * jax.random.normal(ks[6], (h1, h2), jnp.float32)).astype(jnp.bfloat16)
    b2 = sc * jax.random.normal(ks[7], (h2,), jnp.float32)
    g2 = 1.0 + sc * jax.random.normal(ks[8], (h2,), jnp.float32)
    be2 = sc * jax.random.normal(ks[9], (h2,), jnp.float32)
    m2 = sc * jax.random.normal(ks[10], (h2,), jnp.float32)
    v2 = jnp.abs(1.0 + sc * jax.random.normal(ks[11], (h2,), jnp.float32))

    w3 = (sc * jax.random.normal(ks[12], (1, h2), jnp.float32)).astype(jnp.bfloat16)
    b3 = sc * jax.random.normal(ks[13], (1, 1), jnp.float32)

    a1 = fold_linear_bn(b1, g1, be1, m1, v1)
    a2 = fold_linear_bn(b2, g2, be2, m2, v2)
    return (w1, a1, w2, a2, w3, b3)


def reference(features_nchw, params):
    """Pure-JAX reference mirroring the kernel's bf16 quantization points."""
    w1, a1, w2, a2, w3, b3 = params
    B = features_nchw.shape[0]
    x = features_nchw.reshape(B, -1).astype(jnp.bfloat16).astype(jnp.float32)
    w1f = w1.astype(jnp.float32)
    w2f = w2.astype(jnp.float32)
    w3f = w3.astype(jnp.float32)
    h1 = jnp.maximum(x @ w1f * a1[0] + a1[1], 0.0)
    h1 = h1.astype(jnp.bfloat16).astype(jnp.float32)
    h2 = jnp.maximum(h1 @ w2f * a2[0] + a2[1], 0.0)
    return jnp.sum(h2 * w3f[0], axis=-1, keepdims=True) + b3[0, 0]


if __name__ == "__main__":
    # Small shapes consistent with the module's structure
    # (scaled down from 1280 x 7 x 7 -> 2048 -> 512 -> 1).
    B, C, HF, WF = 12, 32, 4, 4          # B not a multiple of 8 -> tests padding
    D_IN = C * HF * WF                    # 512
    H1, H2 = 256, 64                      # feHidden, feHidden // 4 (scaled)

    key = jax.random.PRNGKey(0)
    k_feat, k_param = jax.random.split(key)
    features = jax.random.normal(k_feat, (B, C, HF, WF), jnp.float32)
    params = make_params(k_param, D_IN, H1, H2)

    ref = reference(features, params)

    # 1) Whole batch in one block, K streamed in 128-wide slabs.
    out = dl_model_head(features, params, tile_b=256, tile_k=128)
    out = jax.block_until_ready(out)
    assert out.shape == (B, 1)
    assert jnp.allclose(out, ref, atol=2e-3, rtol=2e-3), "mismatch vs reference"

    # 2) Multi-batch-tile path (2 batch tiles + padded tail, 4 K steps).
    out2 = dl_model_head(features, params, tile_b=8, tile_k=128)
    out2 = jax.block_until_ready(out2)
    assert jnp.allclose(out2, ref, atol=2e-3, rtol=2e-3), "mismatch (tiled batch)"

    print("KERNEL_OK")
</pallas_src>

<mosaic_0001>
module attributes {stable_mosaic.version = 11 : i64} {
  func.func @fefinal_kernel(%arg0: i32, %arg1: i32, %arg2: memref<16x128xbf16, #tpu.memory_space<vmem>>, %arg3: memref<128x256xbf16, #tpu.memory_space<vmem>>, %arg4: memref<2x256xf32, #tpu.memory_space<vmem>>, %arg5: memref<256x64xbf16, #tpu.memory_space<vmem>>, %arg6: memref<2x64xf32, #tpu.memory_space<vmem>>, %arg7: memref<1x64xbf16, #tpu.memory_space<vmem>>, %arg8: memref<1x1xf32, #tpu.memory_space<smem>>, %arg9: memref<16x1xf32, #tpu.memory_space<vmem>>, %arg10: memref<16x256xf32, #tpu.memory_space<vmem>>) attributes {dimension_semantics = [#tpu.dimension_semantics<parallel>, #tpu.dimension_semantics<arbitrary>], iteration_bounds = array<i64: 1, 4>, scalar_prefetch = 0 : i64, scratch_operands = 1 : i64, tpu.core_type = #tpu.core_type<tc>, window_params = [{transform_indices = @transform_0, window_bounds = array<i64: 16, 128>}, {transform_indices = @transform_1, window_bounds = array<i64: 128, 256>}, {pipeline_mode = #tpu.pipeline_mode<synchronous>, transform_indices = @transform_2, window_bounds = array<i64: 2, 256>}, {pipeline_mode = #tpu.pipeline_mode<synchronous>, transform_indices = @transform_3, window_bounds = array<i64: 256, 64>}, {pipeline_mode = #tpu.pipeline_mode<synchronous>, transform_indices = @transform_4, window_bounds = array<i64: 2, 64>}, {pipeline_mode = #tpu.pipeline_mode<synchronous>, transform_indices = @transform_5, window_bounds = array<i64: 1, 64>}, {transform_indices = @transform_6, window_bounds = array<i64: 1, 1>}, {transform_indices = @transform_7, window_bounds = array<i64: 16, 1>}]} {
    %c0_i32 = arith.constant 0 : i32
    %0 = arith.cmpi eq, %arg1, %c0_i32 : i32
    %1 = arith.extui %0 : i1 to i32
    %c0_i32_0 = arith.constant 0 : i32
    %2 = arith.cmpi ne, %1, %c0_i32_0 : i32
    scf.if %2 {
      %cst_9 = arith.constant 0.000000e+00 : f32
      %12 = vector.broadcast %cst_9 : f32 to vector<16x256xf32>
      %c0_10 = arith.constant 0 : index
      %c0_11 = arith.constant 0 : index
      %13 = vector.load %arg10[%c0_10, %c0_11] : memref<16x256xf32, #tpu.memory_space<vmem>>, vector<16x256xf32>
      tpu.vector_store %arg10[%c0_10, %c0_11], %12 {strides = array<i32>} : memref<16x256xf32, #tpu.memory_space<vmem>>, vector<16x256xf32>,
    } else {
    }
    %c0 = arith.constant 0 : index
    %c0_1 = arith.constant 0 : index
    %3 = vector.load %arg10[%c0, %c0_1] : memref<16x256xf32, #tpu.memory_space<vmem>>, vector<16x256xf32>
    %c0_2 = arith.constant 0 : index
    %c0_3 = arith.constant 0 : index
    %4 = vector.load %arg2[%c0_2, %c0_3] : memref<16x128xbf16, #tpu.memory_space<vmem>>, vector<16x128xbf16>
    %c0_4 = arith.constant 0 : index
    %c0_5 = arith.constant 0 : index
    %5 = vector.load %arg3[%c0_4, %c0_5] : memref<128x256xbf16, #tpu.memory_space<vmem>>, vector<128x256xbf16>
    %cst = arith.constant dense<0.000000e+00> : vector<16x256xf32>
    %6 = tpu.matmul %4, %5, %cst {dimension_numbers = #tpu.dot_dimension_numbers<[1], [0], [0], [1], [0, 0, 1, 1], [], []>} : vector<16x128xbf16>, vector<128x256xbf16>, vector<16x256xf32> -> vector<16x256xf32>
    %7 = arith.addf %3, %6 : vector<16x256xf32>
    %c0_6 = arith.constant 0 : index
    %c0_7 = arith.constant 0 : index
    %8 = vector.load %arg10[%c0_6, %c0_7] : memref<16x256xf32, #tpu.memory_space<vmem>>, vector<16x256xf32>
    tpu.vector_store %arg10[%c0_6, %c0_7], %7 {strides = array<i32>} : memref<16x256xf32, #tpu.memory_space<vmem>>, vector<16x256xf32>,
    %c3_i32 = arith.constant 3 : i32
    %9 = arith.cmpi eq, %arg1, %c3_i32 : i32
    %10 = arith.extui %9 : i1 to i32
    %c0_i32_8 = arith.constant 0 : i32
    %11 = arith.cmpi ne, %10, %c0_i32_8 : i32
    scf.if %11 {
      %c0_9 = arith.constant 0 : index
      %c0_10 = arith.constant 0 : index
      %12 = vector.load %arg10[%c0_9, %c0_10] : memref<16x256xf32, #tpu.memory_space<vmem>>, vector<16x256xf32>
      %c0_11 = arith.constant 0 : index
      %c0_12 = arith.constant 0 : index
      %13 = vector.load %arg4[%c0_11, %c0_12] : memref<2x256xf32, #tpu.memory_space<vmem>>, vector<1x256xf32>
      %14 = vector.shape_cast %13 : vector<1x256xf32> to vector<256xf32>
      %15 = vector.shape_cast %14 : vector<256xf32> to vector<1x256xf32>
      %16 = vector.broadcast %15 : vector<1x256xf32> to vector<16x256xf32>
      %17 = arith.mulf %12, %16 : vector<16x256xf32>
      %c1 = arith.constant 1 : index
      %c0_13 = arith.constant 0 : index
      %18 = vector.load %arg4[%c1, %c0_13] : memref<2x256xf32, #tpu.memory_space<vmem>>, vector<1x256xf32>
      %19 = vector.shape_cast %18 : vector<1x256xf32> to vector<256xf32>
      %20 = vector.shape_cast %19 : vector<256xf32> to vector<1x256xf32>
      %21 = vector.broadcast %20 : vector<1x256xf32> to vector<16x256xf32>
      %22 = arith.addf %17, %21 : vector<16x256xf32>
      %cst_14 = arith.constant 0.000000e+00 : f32
      %23 = vector.broadcast %cst_14 : f32 to vector<16x256xf32>
      %24 = arith.maximumf %22, %23 : vector<16x256xf32>
      %25 = arith.truncf %24 : vector<16x256xf32> to vector<16x256xbf16>
      %c0_15 = arith.constant 0 : index
      %c0_16 = arith.constant 0 : index
      %26 = vector.load %arg5[%c0_15, %c0_16] : memref<256x64xbf16, #tpu.memory_space<vmem>>, vector<256x64xbf16>
      %cst_17 = arith.constant dense<0.000000e+00> : vector<16x64xf32>
      %27 = tpu.matmul %25, %26, %cst_17 {dimension_numbers = #tpu.dot_dimension_numbers<[1], [0], [0], [1], [0, 0, 1, 1], [], []>} : vector<16x256xbf16>, vector<256x64xbf16>, vector<16x64xf32> -> vector<16x64xf32>
      %c0_18 = arith.constant 0 : index
      %c0_19 = arith.constant 0 : index
      %28 = vector.load %arg6[%c0_18, %c0_19] : memref<2x64xf32, #tpu.memory_space<vmem>>, vector<1x64xf32>
      %29 = vector.shape_cast %28 : vector<1x64xf32> to vector<64xf32>
      %30 = vector.shape_cast %29 : vector<64xf32> to vector<1x64xf32>
      %31 = vector.broadcast %30 : vector<1x64xf32> to vector<16x64xf32>
      %32 = arith.mulf %27, %31 : vector<16x64xf32>
      %c1_20 = arith.constant 1 : index
      %c0_21 = arith.constant 0 : index
      %33 = vector.load %arg6[%c1_20, %c0_21] : memref<2x64xf32, #tpu.memory_space<vmem>>, vector<1x64xf32>
      %34 = vector.shape_cast %33 : vector<1x64xf32> to vector<64xf32>
      %35 = vector.shape_cast %34 : vector<64xf32> to vector<1x64xf32>
      %36 = vector.broadcast %35 : vector<1x64xf32> to vector<16x64xf32>
      %37 = arith.addf %32, %36 : vector<16x64xf32>
      %cst_22 = arith.constant 0.000000e+00 : f32
      %38 = vector.broadcast %cst_22 : f32 to vector<16x64xf32>
      %39 = arith.maximumf %37, %38 : vector<16x64xf32>
      %c0_23 = arith.constant 0 : index
      %c0_24 = arith.constant 0 : index
      %40 = vector.load %arg7[%c0_23, %c0_24] : memref<1x64xbf16, #tpu.memory_space<vmem>>, vector<1x64xbf16>
      %41 = vector.shape_cast %40 : vector<1x64xbf16> to vector<64xbf16>
      %42 = arith.extf %41 : vector<64xbf16> to vector<64xf32>
      %43 = vector.shape_cast %42 : vector<64xf32> to vector<1x64xf32>
      %44 = vector.broadcast %43 : vector<1x64xf32> to vector<16x64xf32>
      %45 = arith.mulf %39, %44 : vector<16x64xf32>
      %cst_25 = arith.constant dense<0.000000e+00> : vector<16xf32>
      %46 = vector.multi_reduction <add>, %45, %cst_25 [1] : vector<16x64xf32> to vector<16xf32>
      %47 = vector.shape_cast %46 : vector<16xf32> to vector<16x1xf32>
      %c0_26 = arith.constant 0 : index
      %c0_27 = arith.constant 0 : index
      %48 = memref.load %arg8[%c0_26, %c0_27] : memref<1x1xf32, #tpu.memory_space<smem>>
      %49 = vector.broadcast %48 : f32 to vector<16x1xf32>
      %50 = arith.addf %47, %49 : vector<16x1xf32>
      %c0_28 = arith.constant 0 : index
      %c0_29 = arith.constant 0 : index
      %51 = vector.load %arg9[%c0_28, %c0_29] : memref<16x1xf32, #tpu.memory_space<vmem>>, vector<16x1xf32>
      tpu.vector_store %arg9[%c0_28, %c0_29], %50 {strides = array<i32>} : memref<16x1xf32, #tpu.memory_space<vmem>>, vector<16x1xf32>,
    } else {
    }
    return
  }
  func.func @transform_0(%arg0: i32, %arg1: i32) -> (i32, i32) {
    %c0_i32 = arith.constant 0 : i32
    return %arg0, %arg1 : i32, i32
  }
  func.func @transform_1(%arg0: i32, %arg1: i32) -> (i32, i32) {
    %c0_i32 = arith.constant 0 : i32
    %c0_i32_0 = arith.constant 0 : i32
    return %arg1, %c0_i32 : i32, i32
  }
  func.func @transform_2(%arg0: i32, %arg1: i32) -> (i32, i32) {
    %c0_i32 = arith.constant 0 : i32
    %c0_i32_0 = arith.constant 0 : i32
    %c0_i32_1 = arith.constant 0 : i32
    return %c0_i32, %c0_i32_0 : i32, i32
  }
  func.func @transform_3(%arg0: i32, %arg1: i32) -> (i32, i32) {
    %c0_i32 = arith.constant 0 : i32
    %c0_i32_0 = arith.constant 0 : i32
    %c0_i32_1 = arith.constant 0 : i32
    return %c0_i32, %c0_i32_0 : i32, i32
  }
  func.func @transform_4(%arg0: i32, %arg1: i32) -> (i32, i32) {
    %c0_i32 = arith.constant 0 : i32
    %c0_i32_0 = arith.constant 0 : i32
    %c0_i32_1 = arith.constant 0 : i32
    return %c0_i32, %c0_i32_0 : i32, i32
  }
  func.func @transform_5(%arg0: i32, %arg1: i32) -> (i32, i32) {
    %c0_i32 = arith.constant 0 : i32
    %c0_i32_0 = arith.constant 0 : i32
    %c0_i32_1 = arith.constant 0 : i32
    return %c0_i32, %c0_i32_0 : i32, i32
  }
  func.func @transform_6(%arg0: i32, %arg1: i32) -> (i32, i32) {
    %c0_i32 = arith.constant 0 : i32
    %c0_i32_0 = arith.constant 0 : i32
    %c0_i32_1 = arith.constant 0 : i32
    return %c0_i32, %c0_i32_0 : i32, i32
  }
  func.func @transform_7(%arg0: i32, %arg1: i32) -> (i32, i32) {
    %c0_i32 = arith.constant 0 : i32
    %c0_i32_0 = arith.constant 0 : i32
    return %arg0, %c0_i32 : i32, i32
  }
}

</mosaic_0001>

<bundles_post_ra>
// kernel: tpu_custom_call.1
= control target key start
LH: loop header
LB: loop body
LE: loop exit
PB: predicated region body
PF: predicated region fallthrough
CT: control target
= control target key end

     0   :  { %s1386_s0 = inlined_call_operand.vmem [shape: bf16[16,512], index: 0, kind: input, shape index: {}]   ;;  %s1387_s1 = inlined_call_operand.hbm [shape: bf16[512,256], index: 1, kind: input, shape index: {}]   ;;  %s1388_s2 = inlined_call_operand.vmem [shape: f32[2,256], index: 2, kind: input, shape index: {}]   ;;  %s1389_s3 = inlined_call_operand.vmem [shape: bf16[256,64], index: 3, kind: input, shape index: {}]   ;;  %s1390_s4 = inlined_call_operand.vmem [shape: f32[2,64], index: 4, kind: input, shape index: {}]   ;;  %s1391_s5 = inlined_call_operand.vmem [shape: bf16[1,64], index: 5, kind: input, shape index: {}]   ;;  %s1392_s6 = inlined_call_operand.<no memory space> [shape: f32[1,1], index: 6, kind: input, shape index: {}]   ;;  %s1393_s7 = inlined_call_operand.vmem [shape: f32[16,1], index: 7, kind: output, shape index: {}]  }
   0x1   :  { %12 = sst [smem:[#allocation3]] %s1392_s6 }
   0x2   :  { %13 = vsyncpa [#allocation6], 0 }
   0x3   :  { %15 = vsyncpa [#allocation6 + $0x1], 0  ;;  %s1202_s26 = smov 0   ;;  %s1204_s27 = smov 0  }
   0x4   :  { %s1206_s28 = smov 0   ;;  %s1208_s29 = smov 0  }
   0x5   :  { %s1210_s30 = smov 0   ;;  %s1212_s8 = smov 0  }
   0x6 LB: > { %s903_s6 = sadd.s32 4294967295, %s1152_s8   ;;  %s30_s9 = sadd.s32 1, %s1148_s30  ;;  %s1152_s8 = sphi %s1212_s8, %s21_s8   ;;  %s1148_s30 = sphi %s1210_s30, %s1400_s30   ;;  %s1144_s29 = sphi %s1208_s29, %s1399_s29   ;;  %s1140_s28 = sphi %s1206_s28, %s1398_s28   ;;  %s1136_s27 = sphi %s1204_s27, %s1397_s27   ;;  %s1132_s26 = sphi %s1202_s26, %s1396_s26  }
   0x7   : > { %p31_p0 = scmp.ge.s32.totalorder %s30_s9, 4  ;;  %s42_s10 = sadd.s32 1, %s1140_s28 }
   0x8   : > { %p49_p1 = scmp.ne.s32.totalorder %s1140_s28, %s1136_s27  ;;  %p50_p2 = scmp.eq.s32.totalorder %s1152_s8, 0 }
   0x9   : > { %s1402_s9 = smov (%p31_p0, %s30_s9), 0  ;;  %p81_p4 = scmp.ne.s32.totalorder %s1136_s27, %s1132_s26 }
   0xa   : > { %p1238_p3 = por %p50_p2, %p49_p1  ;;  %s38_s12 = ssub.s32 %s1148_s30, %s1402_s9 }
   0xb   : > { %p82_p5 = scmp.eq.s32.totalorder %s903_s6, 0  ;;  %p40_p6 = scmp.eq.s32.totalorder %s38_s12, 0 }
   0xc   : > { %p905_p8 = scmp.ge.s32.totalorder %s1152_s8, 4 }
   0xd   : > { %p1245_p7 = por %p82_p5, %p81_p4 }
   0xe   : > { %s1250_s14 = scalar_select %p40_p6, %s1140_s28, %s42_s10  }
   0xf   : > { %247 = sbr.rel (%p905_p8) target bundleno = 41 (0x29), region = 36 }
  0x14   : > { %250 = sbr.rel (!%p1238_p3) target bundleno = 25 (0x19), region = 40  ;;  %s252_s15 = sand.u32 (%p1238_p3), 1, %s1140_s28  }
  0x15   : > { %s907_s16 = sshll.u32 (%p1238_p3), %s1148_s30, 2  ;;  %s906_s17 = sshll.u32 (%p1238_p3), %s252_s15, 3 }
  0x16   : > { %s259_s20 = scalar_lea.vmem (%p1238_p3), %s1386_s0, %s907_s16  ;;  %s254_s21 = scalar_lea.vmem (%p1238_p3), [#allocation4], %s906_s17 }
  0x17   : > { %v276_v0 = vld [vmem:[%s259_s20] sm:$0xf] (%p1238_p3)  ;;  %v278_v1 = vld [vmem:[%s259_s20 + $0x10] sm:$0xf] (%p1238_p3) }
  0x18   : > { %277 = vst [vmem:[%s254_s21] sm:$0xf] (%p1238_p3), %v276_v0  ;;  %279 = vst [vmem:[%s254_s21 + $0x4] sm:$0xf] (%p1238_p3), %v278_v1 }
  0x19 PF: > { %s308_s22 = sand.u32 1, %s1140_s28   ;;  %s958_s23 = sshll.u32 %s1148_s30, 11 }
  0x1a   : > { %s908_s24 = sshll.u32 %s308_s22, 7  ;;  %s319_s6 = scalar_lea.hbm %s1387_s1, %s958_s23 }
  0x1b   : > { %s312_s10 = scalar_lea.vmem [#allocation5], %s908_s24  ;;  %s309_s15 = scalar_lea.sflag [#allocation6], %s308_s22 }
  0x1c   : > { %s320_s12 = sshll.u32 %s312_s10, 4  ;;  %s1154_s17 = smov [#allocation5]   ;;  %s321_s12 = int_to_ptr.vmem [resolvable:$true] %s320_s12 }
  0x1d   : > { %s1088_s16 = scalar_lea.vmem %s321_s12, 2048  ;;  %s1092_s18 = sshll.u32 %s1154_s17, 4  ;;  %s1093_s18 = int_to_ptr.vmem [resolvable:$false] %s1092_s18 }
  0x1e   : > { %p1089_p9 = scmp.ne.s32.totalorder %s321_s12, %s1088_s16  ;;  %s1094_s19 = scalar_lea.vmem %s1093_s18, 4096 }
  0x1f   : > { %p1095_p12 = scmp.lt.s32.totalorder %s321_s12, %s1093_s18  ;;  %p1096_p13 = scmp.lt.s32.totalorder %s1094_s19, %s1088_s16 }
  0x20   : > { %p1090_p10 = pnand %p1089_p9, %p1238_p3 }
  0x21   : > { %p1097_p0 = por %p1096_p13, %p1095_p12 }
  0x22   : > { %p1091_p11 = pneg %p1090_p10 }
  0x24   : > { %p1098_p1 = pnand %p1097_p0, %p1091_p11 }
  0x26   : > { %1101 = shalt.err (!%p1098_p1)
}
  0x27   : > { %s1155_s20 = smov 128   ;;  %s1156_s21 = smov 8  }
  0x28   : > { %981 = dma.hbm_to_vmem [thread:$0]  (%p1238_p3), %s319_s6, 2048, %s321_s12, %s309_s15, %s1155_s20, %s1155_s20, %s1156_s21  }
  0x29 PF: > { %p912_p2 = scmp.ge.s32.totalorder %s1152_s8, 1  ;;  %p328_p4 = scmp.lt.s32.totalorder %s1152_s8, 5 }
  0x2b   : > { %p329_p5 = pnand %p912_p2, %p328_p4 }
  0x2c   : > { %s335_s22 = sand.u32 (!%p329_p5), 1, %s1136_s27  }
  0x2d   : > { %332 = sbr.rel (%p329_p5) target bundleno = 680 (0x2a8), region = 85  ;;  %s913_s23 = sshll.u32 (!%p329_p5), %s335_s22, 3 }
  0x2e   : > { %s914_s24 = sshll.u32 (!%p329_p5), %s335_s22, 7  ;;  %s1272_s25 = scalar_lea.vmem (!%p329_p5), [#allocation4], %s913_s23 }
  0x2f   : > { %s342_s26 = scalar_lea.sflag (!%p329_p5), [#allocation6], %s335_s22  ;;  %s1274_s10 = scalar_lea.vmem (!%p329_p5), [#allocation5], %s914_s24 }
  0x32   : > { %1127 = dma.done.wait (%p1245_p7), %s342_s26, 2048  }
  0x33   : > { %1129 = vsyncadd (%p1245_p7), %s342_s26, 4294965248  ;;  %p915_p3 = scmp.ne.s32.totalorder %s1144_s29, 0 }
  0x35   : > { %392 = sbr.rel (%p915_p3) target bundleno = 61 (0x3d), region = 97 }
  0x3a   : > { %v1157_v2 = vmov 0.0  }
  0x3b   : > { %393 = vst [vmem:[#allocation2 + $0x10] sm:$0xff] %v1157_v2  ;;  %394 = vst [vmem:[#allocation2] sm:$0xff] %v1157_v2 }
  0x3c   : > { %395 = vst [vmem:[#allocation2 + $0x18] sm:$0xff] %v1157_v2  ;;  %396 = vst [vmem:[#allocation2 + $0x8] sm:$0xff] %v1157_v2 }
  0x3d PF: > { %v1035_v3 = vld [vmem:[%s1274_s10 + $0x74] ss:$8 sps:$4 sm:$0xff]   ;;  %v1037_v4 = vld [vmem:[%s1274_s10 + $0x70] ss:$8 sps:$4 sm:$0xff]   ;;  %v1158_v5 = vmov 0   ;;  %p933_p6 = scmp.ne.s32.totalorder %s1144_s29, 3 }
  0x3e   : > { %537 = vmatprep.mubr.bf16.mxu0 %v1158_v5  ;;  %505 = vmatprep.subr.bf16.mxu0 %v1035_v3  ;;  %v1038_v6 = vld [vmem:[%s1274_s10 + $0x64] ss:$8 sps:$4 sm:$0xff]   ;;  %v1040_v7 = vld [vmem:[%s1274_s10 + $0x60] ss:$8 sps:$4 sm:$0xff]   ;;  %v1041_v8 = vld [vmem:[%s1274_s10 + $0x54] ss:$8 sps:$4 sm:$0xff]  }
  0x3f   : > { %506 = vmatpush1.bf16.msra.mxu0 %v1037_v4  ;;  %v1043_v9 = vld [vmem:[%s1274_s10 + $0x50] ss:$8 sps:$4 sm:$0xff]   ;;  %v1044_v10 = vld [vmem:[%s1274_s10 + $0x44] ss:$8 sps:$4 sm:$0xff]   ;;  %v1046_v11 = vld [vmem:[%s1274_s10 + $0x40] ss:$8 sps:$4 sm:$0xff]  }
  0x40   : > { %507 = vmatprep.subr.bf16.mxu0 %v1038_v6  ;;  %v1047_v12 = vld [vmem:[%s1274_s10 + $0x34] ss:$8 sps:$4 sm:$0xff]   ;;  %v1049_v13 = vld [vmem:[%s1274_s10 + $0x30] ss:$8 sps:$4 sm:$0xff]   ;;  %v1050_v14 = vld [vmem:[%s1274_s10 + $0x24] ss:$8 sps:$4 sm:$0xff]  }
  0x41   : > { %v1052_v15 = vld [vmem:[%s1274_s10 + $0x20] ss:$8 sps:$4 sm:$0xff]   ;;  %v1053_v16 = vld [vmem:[%s1274_s10 + $0x14] ss:$8 sps:$4 sm:$0xff]   ;;  %v1055_v17 = vld [vmem:[%s1274_s10 + $0x10] ss:$8 sps:$4 sm:$0xff]  }
  0x42   : > { %v1056_v18 = vld [vmem:[%s1274_s10 + $0x4] ss:$8 sps:$4 sm:$0xff]   ;;  %v1058_v19 = vld [vmem:[%s1274_s10] ss:$8 sps:$4 sm:$0xff]   ;;  %v1059_v20 = vld [vmem:[%s1272_s25] sm:$0xff]   ;;  %s803_s17 = sld [smem:[#allocation3]] (!%p933_p6) }
  0x43   : > { %508 = vmatpush1.bf16.msra.mxu0 %v1040_v7  ;;  %v397_v21 = vld [vmem:[#allocation2 + $0x10] sm:$0xff]  ;;  %v398_v23 = vld [vmem:[#allocation2] sm:$0xff]  ;;  %v399_v26 = vld [vmem:[#allocation2 + $0x18] sm:$0xff] }
  0x44   : > { %509 = vmatprep.subr.bf16.mxu0 %v1041_v8  ;;  %v400_v29 = vld [vmem:[#allocation2 + $0x8] sm:$0xff] }
  0x47   : > { %510 = vmatpush1.bf16.msra.mxu0 %v1043_v9 }
  0x48   : > { %511 = vmatprep.subr.bf16.mxu0 %v1044_v10 }
  0x4b   : > { %512 = vmatpush1.bf16.msra.mxu0 %v1046_v11 }
  0x4c   : > { %513 = vmatprep.subr.bf16.mxu0 %v1047_v12 }
  0x4f   : > { %514 = vmatpush1.bf16.msra.mxu0 %v1049_v13 }
  0x50   : > { %515 = vmatprep.subr.bf16.mxu0 %v1050_v14 }
  0x53   : > { %516 = vmatpush1.bf16.msra.mxu0 %v1052_v15 }
  0x54   : > { %517 = vmatprep.subr.bf16.mxu0 %v1053_v16 }
  0x57   : > { %518 = vmatpush1.bf16.msra.mxu0 %v1055_v17 }
  0x58   : > { %519 = vmatprep.subr.bf16.mxu0 %v1056_v18 }
  0x5b   : > { %520 = vmatpush1.bf16.msra.mxu0 %v1058_v19 }
  0x5e   : > { %538 = vmatmul.mubr.bf16.vlgmr.msra.gmra.mxu0 %v1059_v20 }
 0x11e   : > { %v539_v22 = vpop.f32.mrf.mxu0 }
 0x11f   : > { %v548_v24 = vadd.f32 %v539_v22, %v397_v21 }
 0x120   : > { %v541_v25 = vpop.f32.mrf.mxu0 }
 0x121   : > { %552 = vst [vmem:[#allocation2 + $0x10] sm:$0xff] %v548_v24  ;;  %v549_v27 = vadd.f32 %v541_v25, %v398_v23 }
 0x122   : > { %v543_v28 = vpop.f32.mrf.mxu0 }
 0x123   : > { %553 = vst [vmem:[#allocation2] sm:$0xff] %v549_v27  ;;  %v550_v30 = vadd.f32 %v543_v28, %v399_v26  ;;  %559 = sbr.rel (%p933_p6) target bundleno = 680 (0x2a8), region = 101 }
 0x124   : > { %v545_v31 = vpop.f32.mrf.mxu0 }
 0x125   : > { %554 = vst [vmem:[#allocation2 + $0x18] sm:$0xff] %v550_v30  ;;  %v551_v32 = vadd.f32 %v545_v31, %v400_v29 }
 0x127   : > { %555 = vst [vmem:[#allocation2 + $0x8] sm:$0xff] %v551_v32 }
 0x128   : > { %v1060_v33 = vld [vmem:[%s1389_s3 + $0x78] sm:$0xff]   ;;  %v1062_v35 = vld [vmem:[%s1389_s3 + $0x70] sm:$0xff]   ;;  %v1064_v37 = vld [vmem:[%s1389_s3 + $0x68] sm:$0xff]   ;;  %v566_v38 = vlaneseq  ;;  %vm796_vm0 = vcmask 523264   ;;  %vm807_vm1 = vcmask 7168  }
 0x129   : > { %v1061_v34 = vld [vmem:[%s1389_s3 + $0x38] sm:$0xff]   ;;  %959 = vmatprep.subr.bf16.mxu0 %v1060_v33  ;;  %v1063_v36 = vld [vmem:[%s1389_s3 + $0x30] sm:$0xff]   ;;  %v1065_v39 = vld [vmem:[%s1389_s3 + $0x28] sm:$0xff]  }
 0x12a   : > { %960 = vmatpush3.bf16.msra.mxu0 %v1061_v34  ;;  %v1066_v40 = vld [vmem:[%s1389_s3 + $0x60] sm:$0xff]   ;;  %v567_v41 = vshrl.u32 %v566_v38, 7  ;;  %v1068_v43 = vld [vmem:[%s1389_s3 + $0x58] sm:$0xff]   ;;  %v1070_v47 = vld [vmem:[%s1389_s3 + $0x50] sm:$0xff]   ;;  %v804_v34 = vstv %s803_s17 }
 0x12b   : > { %961 = vmatprep.subr.bf16.mxu0 %v1062_v35  ;;  %v1067_v42 = vld [vmem:[%s1389_s3 + $0x20] sm:$0xff]   ;;  %v1069_v46 = vld [vmem:[%s1389_s3 + $0x18] sm:$0xff]   ;;  %v560_v54 = vld [vmem:[#allocation2 + $0x10] sm:$0xff] }
 0x12c   : > { %v568_v44 = vsub.s32 0, %v567_v41  ;;  %v572_v45 = vsub.s32 1, %v567_v41  ;;  %v561_v48 = vld [vmem:[#allocation2] sm:$0xff]  ;;  %v562_v55 = vld [vmem:[#allocation2 + $0x18] sm:$0xff]  ;;  %v1071_v58 = vld [vmem:[%s1389_s3 + $0x10] sm:$0xff]  }
 0x12d   : > { %v564_v50 = vld [vmem:[%s1388_s2] ss:$2 sm:$0x3]  ;;  %v934_v53 = vld [vmem:[%s1388_s2 + $0x1] ss:$2 sm:$0x3] }
 0x12e   : > { %962 = vmatpush3.bf16.msra.mxu0 %v1063_v36  ;;  %v563_v49 = vld [vmem:[#allocation2 + $0x8] sm:$0xff]  ;;  %v569_v51 = vrot.slane %v564_v50, %v568_v44  ;;  %v573_v52 = vrot.slane %v564_v50, %v572_v45  ;;  %v586_v56 = vrot.slane %v934_v53, %v568_v44  ;;  %v590_v57 = vrot.slane %v934_v53, %v572_v45  ;;  %v1074_v7 = vld [vmem:[%s1389_s3 + $0x40] sm:$0xff]  }
 0x12f   : > { %963 = vmatprep.subr.bf16.mxu0 %v1064_v37  ;;  %v1072_v63 = vld [vmem:[%s1389_s3 + $0x48] sm:$0xff]   ;;  %v1075_v11 = vld [vmem:[%s1389_s3] sm:$0xff]  }
 0x130   : > { %v577_v59 = vmul.f32 %v573_v52, %v561_v48  ;;  %v579_v60 = vmul.f32 %v573_v52, %v563_v49  ;;  %v576_v61 = vmul.f32 %v569_v51, %v560_v54  ;;  %v578_v62 = vmul.f32 %v569_v51, %v562_v55  ;;  %v1073_v4 = vld [vmem:[%s1389_s3 + $0x8] sm:$0xff]   ;;  %v788_v14 = vld [vmem:[%s1391_s5] sm:$0x1]  ;;  %v952_v20 = vld [vmem:[%s1390_s4 + $0x1] ss:$0 sm:$0xff] }
 0x131   : > { %v951_v16 = vld [vmem:[%s1390_s4] ss:$0 sm:$0xff]  ;;  %v789_v18 = vunpack.c.l.bf16 %v788_v14 }
 0x132   : > { %964 = vmatpush3.bf16.msra.mxu0 %v1065_v39  ;;  %v594_v0 = vadd.f32 %v590_v57, %v577_v59  ;;  %v596_v1 = vadd.f32 %v590_v57, %v579_v60  ;;  %v593_v2 = vadd.f32 %v586_v56, %v576_v61  ;;  %v595_v3 = vadd.f32 %v586_v56, %v578_v62 }
 0x133   : > { %965 = vmatprep.subr.bf16.mxu0 %v1066_v40  ;;  %v793_v25 = vrot.slane %v789_v18, %v568_v44 }
 0x134   : > { %v598_v5 = vmax.f32 %v594_v0, 0.0  ;;  %v600_v6 = vmax.f32 %v596_v1, 0.0  ;;  %v597_v9 = vmax.f32 %v593_v2, 0.0  ;;  %v599_v10 = vmax.f32 %v595_v3, 0.0 }
 0x136   : > { %966 = vmatpush3.bf16.msra.mxu0 %v1067_v42  ;;  %v602_v8 = vpack.c.bf16 %v600_v6, %v598_v5  ;;  %v601_v12 = vpack.c.bf16 %v599_v10, %v597_v9 }
 0x137   : > { %967 = vmatprep.subr.bf16.mxu0 %v1068_v43 }
 0x138   : > { %763 = vmatprep.mubr.bf16.mxu0 %v602_v8 }
 0x13a   : > { %968 = vmatpush3.bf16.msra.mxu0 %v1069_v46 }
 0x13b   : > { %969 = vmatprep.subr.bf16.mxu0 %v1070_v47 }
 0x13e   : > { %970 = vmatpush3.bf16.msra.mxu0 %v1071_v58 }
 0x13f   : > { %971 = vmatprep.subr.bf16.mxu0 %v1072_v63 }
 0x142   : > { %972 = vmatpush3.bf16.msra.mxu0 %v1073_v4 }
 0x143   : > { %973 = vmatprep.subr.bf16.mxu0 %v1074_v7 }
 0x146   : > { %974 = vmatpush3.bf16.msra.mxu0 %v1075_v11 }
 0x149   : > { %764 = vmatmul.mubr.bf16.vlgmr.msra.gmra.mxu0 %v601_v12 }
 0x209   : > { %v975_v13 = vpop.f32.mrf.mxu0 }
 0x20b   : > { %v976_v15 = vpop.f32.mrf.mxu0 }
 0x20c   : > { %v977_v17 = vadd.f32 %v976_v15, %v975_v13 }
 0x20d   : > { %v978_v19 = vpop.f32.mrf.mxu0 }
 0x20e   : > { %v777_v21 = vmul.f32 %v977_v17, %v951_v16 }
 0x20f   : > { %v979_v22 = vpop.f32.mrf.mxu0 }
 0x210   : > { %v980_v23 = vadd.f32 %v979_v22, %v978_v19  ;;  %v784_v24 = vadd.f32 %v952_v20, %v777_v21 }
 0x212   : > { %v778_v26 = vmul.f32 %v980_v23, %v951_v16  ;;  %v786_v27 = vmax.f32 %v784_v24, 0.0 }
 0x214   : > { %v785_v28 = vadd.f32 %v952_v20, %v778_v26  ;;  %v794_v29 = vmul.f32 %v793_v25, %v786_v27 }
 0x216   : > { %v797_v30 = vsel %vm796_vm0, %v794_v29, 0.0  ;;  %v787_v31 = vmax.f32 %v785_v28, 0.0 }
 0x217   : > { %798 = vadd.xlane.f32.xlu0 %v797_v30 }
 0x218   : > { %v795_v32 = vmul.f32 %v793_v25, %v787_v31 }
 0x21a   : > { %v800_v33 = vsel %vm796_vm0, %v795_v32, 0.0 }
 0x21b   : > { %801 = vadd.xlane.f32.xlu0 %v800_v33 }
 0x2a0   : > { %v799_v35 = vpop.xlane.xlu0 %798 }
 0x2a1   : > { %v805_v36 = vadd.f32 %v804_v34, %v799_v35 }
 0x2a3   : > { %808 = vst.msk [vmem:[%s1393_s7] sm:$0xff] %vm807_vm1, %v805_v36 }
 0x2a4   : > { %v802_v37 = vpop.xlane.xlu0 %801 }
 0x2a5   : > { %v806_v38 = vadd.f32 %v804_v34, %v802_v37 }
 0x2a7   : > { %809 = vst.msk [vmem:[%s1393_s7 + $0x8] sm:$0xff] %vm807_vm1, %v806_v38 }
 0x2a8 PF: > { %s21_s8 = sadd.s32 1, %s1152_s8   ;;  %s1396_s26 = smov %s1136_s27 }
 0x2a9   : > { %p18_p7 = scmp.ge.s32.totalorder %s21_s8, 6   ;;  %s1397_s27 = smov %s1140_s28 }
 0x2aa   : > { %s1398_s28 = smov %s1250_s14  ;;  %s1399_s29 = smov %s1148_s30 }
 0x2ab   : > { %s1400_s30 = smov %s1402_s9  ;;  %20 = sbr.rel (!%p18_p7) target bundleno = 6 (0x6), region = 146 }
 0x2b0   :  { %832 = vsyncpa [#allocation6], 1 }
 0x2b1   :  { %834 = vsyncpa [#allocation6 + $0x1], 1 }

</bundles_post_ra>
